<compile_context>
chip_gen: v7x
topology: tpu7x:2x2x1
jax: 0.10.0
libtpu: 0.0.40
codegen_flags: <defaults>
</compile_context>

<pallas_src>
import jax
import jax.numpy as jnp
from jax.experimental import pallas as pl
from jax.experimental.pallas import tpu as pltpu


def _make_mdn_kernel(tanh_dtype):
    """Build the kernel with a chip-appropriate tanh compute dtype."""

    def mdn_kernel(x_ref, wb_w_ref, wb_b_ref, hd_w_ref, hd_b_ref, out_ref):
        """One batch tile of the MDN forward pass.

        x_ref    : (TB, n_input)        f32  (cast to bf16 in-kernel)
        wb_w_ref : (n_input, n_hidden)  bf16
        wb_b_ref : (1, n_hidden)        f32
        hd_w_ref : (n_hidden, 3*G)      bf16   (pi | sigma | mu heads fused)
        hd_b_ref : (1, 3*G)             f32
        out_ref  : (TB, 3*G)            f32    (pi | sigma | mu concatenated)
        """
        g3 = out_ref.shape[1]
        G = g3 // 3

        # In-kernel bf16 cast of x: x travels HBM->VMEM once as f32, the cast
        # is cheap VPU work hidden under the pipeline (no separate XLA pass).
        x_bf = x_ref[...].astype(jnp.bfloat16)

        # Hidden layer: bf16 operands on the MXU, f32 accumulation + bias.
        pre = (
            jnp.dot(x_bf, wb_w_ref[...], preferred_element_type=jnp.float32)
            + wb_b_ref[...]
        )
        # tanh on the EUP: bf16 path on v6e/v7x, f32 on v5e.  z_h feeds the
        # bf16 head matmul either way.
        z_h = jnp.tanh(pre.astype(tanh_dtype)).astype(jnp.bfloat16)

        # Single fused (pi | sigma | mu) head matmul + fused bias add:
        # one MXU push instead of three 4-lane-wide ones.
        h = (
            jnp.dot(z_h, hd_w_ref[...], preferred_element_type=jnp.float32)
            + hd_b_ref[...]
        )                                                  # (TB, 3*G) f32

        # pi head: softmax over the gaussian axis (dim=1), approx EUP
        # reciprocal instead of a VPU divide.
        pi_logits = h[:, 0:G]
        m = jnp.max(pi_logits, axis=1, keepdims=True)
        e = jnp.exp(pi_logits - m)
        inv_den = pl.reciprocal(jnp.sum(e, axis=1, keepdims=True), approx=True)
        pi = e * inv_den

        # sigma head: exp of linear (f32 on the EUP).
        sigma = jnp.exp(h[:, G:2 * G])

        # mu head: plain linear.
        mu = h[:, 2 * G:3 * G]

        # Single full-block store (one vst/writeback path instead of three
        # 4-lane masked stores).
        out_ref[...] = jnp.concatenate([pi, sigma, mu], axis=1)

    return mdn_kernel


def _tanh_dtype():
    """bf16 tanh on v6e / v7x (bf16 EUP datapath), f32 elsewhere (v5e, v4...)."""
    try:
        kind = jax.devices()[0].device_kind.lower()
    except Exception:  # pragma: no cover - defensive; default to safe f32
        kind = ""
    if "v6" in kind or "v7" in kind:
        return jnp.bfloat16
    return jnp.float32


def _choose_batch_tile(B, block_b):
    """Batch tile: multiple of 16 (bf16 sublane packing), as large as block_b,
    but arranged so the grid has >= 2 steps when the batch allows it (so the
    "parallel" batch axis can shard across the two TensorCores on v7x)."""
    if B <= 16:
        return B                      # tile == full dim, (8,128) rule satisfied
    tb = min(block_b, B)
    if tb >= B:
        # Whole batch would be a single tile -> split into two 16-aligned tiles.
        half = (B + 1) // 2
        tb = ((half + 15) // 16) * 16
    else:
        tb = (tb // 16) * 16 or tb
    return max(min(tb, B), 1)


def mdn_forward(x, params, *, block_b=1024):
    """x: (B, n_input) float32.

    params: dict with
      wb_w  : (n_input, n_hidden)       bf16  hidden-layer weight ((in, out))
      wb_b  : (1, n_hidden)             f32   hidden-layer bias
      head_w: (n_hidden, 3*n_gaussians) bf16  fused [pi | sigma | mu] weights
      head_b: (1, 3*n_gaussians)        f32   fused [pi | sigma | mu] biases

    Returns (pi, sigma, mu), each (B, n_gaussians) float32.
    """
    B, n_input = x.shape
    n_hidden = params["wb_w"].shape[1]
    g3 = params["head_w"].shape[1]
    G = g3 // 3

    TB = _choose_batch_tile(B, block_b)
    grid = (pl.cdiv(B, TB),)

    wb_w = params["wb_w"]               # already bf16 (stored at init)
    hd_w = params["head_w"]             # already bf16 (stored at init)
    wb_b = params["wb_b"]               # f32
    hd_b = params["head_b"]             # f32

    out = pl.pallas_call(
        _make_mdn_kernel(_tanh_dtype()),
        out_shape=jax.ShapeDtypeStruct((B, g3), jnp.float32),
        grid=grid,
        in_specs=[
            pl.BlockSpec((TB, n_input), lambda i: (i, 0)),        # x: batch-tiled
            pl.BlockSpec((n_input, n_hidden), lambda i: (0, 0)),  # weights resident
            pl.BlockSpec((1, n_hidden), lambda i: (0, 0)),
            pl.BlockSpec((n_hidden, g3), lambda i: (0, 0)),
            pl.BlockSpec((1, g3), lambda i: (0, 0)),
        ],
        out_specs=pl.BlockSpec((TB, g3), lambda i: (i, 0)),
        compiler_params=pltpu.CompilerParams(
            # Batch tiles are independent -> shard across TCs on v7x megacore.
            dimension_semantics=("parallel",),
        ),
    )(x.astype(jnp.float32), wb_w, wb_b, hd_w, hd_b)

    # Free layout plumbing: split the lane-dense slab back into the three
    # PyTorch outputs.
    pi = out[:, 0:G]
    sigma = out[:, G:2 * G]
    mu = out[:, 2 * G:3 * G]
    return pi, sigma, mu


def init_params(key, n_input, n_hidden, n_gaussians):
    """Deterministic synthetic init mimicking nn.Linear's U(-1/sqrt(fan_in), ..)
    init.  Weights are stored transposed as (in, out) and ALREADY in bf16 so
    the forward pass never re-casts them; the three head layers are fused
    along the output axis at init time."""
    ks = jax.random.split(key, 8)

    def lin(kw, kb, fan_in, fan_out):
        bound = 1.0 / jnp.sqrt(fan_in)
        w = jax.random.uniform(kw, (fan_in, fan_out), jnp.float32, -bound, bound)
        b = jax.random.uniform(kb, (1, fan_out), jnp.float32, -bound, bound)
        return w, b

    wb_w, wb_b = lin(ks[0], ks[1], n_input, n_hidden)
    pi_w, pi_b = lin(ks[2], ks[3], n_hidden, n_gaussians)
    sg_w, sg_b = lin(ks[4], ks[5], n_hidden, n_gaussians)
    mu_w, mu_b = lin(ks[6], ks[7], n_hidden, n_gaussians)

    head_w = jnp.concatenate([pi_w, sg_w, mu_w], axis=1)   # (n_hidden, 3*G)
    head_b = jnp.concatenate([pi_b, sg_b, mu_b], axis=1)   # (1, 3*G)
    return dict(
        wb_w=wb_w.astype(jnp.bfloat16),
        wb_b=wb_b.astype(jnp.float32),
        head_w=head_w.astype(jnp.bfloat16),
        head_b=head_b.astype(jnp.float32),
    )


def mdn_forward_ref(x, p, tanh_dtype=jnp.float32):
    """Pure-JAX reference mirroring the kernel's bf16-operand / f32-accumulate
    precision choices (including the chip-dependent tanh dtype)."""
    G = p["head_w"].shape[1] // 3
    xb = x.astype(jnp.bfloat16)

    pre = (jnp.dot(xb, p["wb_w"], preferred_element_type=jnp.float32)
           + p["wb_b"])
    z_h = jnp.tanh(pre.astype(tanh_dtype)).astype(jnp.bfloat16)
    h = (jnp.dot(z_h, p["head_w"], preferred_element_type=jnp.float32)
         + p["head_b"])

    pi = jax.nn.softmax(h[:, :G], axis=1)
    sigma = jnp.exp(h[:, G:2 * G])
    mu = h[:, 2 * G:]
    return pi, sigma, mu


if __name__ == "__main__":
    n_input, n_hidden, n_gaussians = 16, 32, 4
    batch = 64

    key = jax.random.PRNGKey(0)
    k_x, k_p = jax.random.split(key)
    x = jax.random.normal(k_x, (batch, n_input), jnp.float32)
    params = init_params(k_p, n_input, n_hidden, n_gaussians)

    # Default block_b -> TB=32, grid=(2,): exercises the multi-step batch grid
    # (and the >=2-step megacore split) on the small demo batch.
    pi, sigma, mu = mdn_forward(x, params)
    jax.block_until_ready((pi, sigma, mu))

    # Sanity check against the pure-JAX reference (approx reciprocal + bf16
    # operands -> moderate tolerances).  NOTE: approx reciprocal means pi rows
    # only approximately sum to 1 (~1e-3 level).
    pi_r, sigma_r, mu_r = mdn_forward_ref(x, params, tanh_dtype=_tanh_dtype())
    assert pi.shape == (batch, n_gaussians)
    assert sigma.shape == (batch, n_gaussians)
    assert mu.shape == (batch, n_gaussians)
    assert jnp.allclose(pi, pi_r, atol=2e-2), "pi mismatch"
    assert jnp.allclose(sigma, sigma_r, rtol=2e-2, atol=2e-2), "sigma mismatch"
    assert jnp.allclose(mu, mu_r, rtol=2e-2, atol=2e-2), "mu mismatch"
    assert jnp.allclose(jnp.sum(pi, axis=1), 1.0, atol=2e-2), "pi rows ~sum to 1"

    print("KERNEL_OK")
</pallas_src>

<mosaic_0001>
module attributes {stable_mosaic.version = 11 : i64} {
  func.func @mdn_kernel(%arg0: i32, %arg1: memref<32x16xf32, #tpu.memory_space<vmem>>, %arg2: memref<16x32xbf16, #tpu.memory_space<vmem>>, %arg3: memref<1x32xf32, #tpu.memory_space<vmem>>, %arg4: memref<32x12xbf16, #tpu.memory_space<vmem>>, %arg5: memref<1x12xf32, #tpu.memory_space<vmem>>, %arg6: memref<32x12xf32, #tpu.memory_space<vmem>>) attributes {dimension_semantics = [#tpu.dimension_semantics<parallel>], iteration_bounds = array<i64: 2>, scalar_prefetch = 0 : i64, scratch_operands = 0 : i64, tpu.core_type = #tpu.core_type<tc>, window_params = [{transform_indices = @transform_0, window_bounds = array<i64: 32, 16>}, {pipeline_mode = #tpu.pipeline_mode<synchronous>, transform_indices = @transform_1, window_bounds = array<i64: 16, 32>}, {pipeline_mode = #tpu.pipeline_mode<synchronous>, transform_indices = @transform_2, window_bounds = array<i64: 1, 32>}, {pipeline_mode = #tpu.pipeline_mode<synchronous>, transform_indices = @transform_3, window_bounds = array<i64: 32, 12>}, {pipeline_mode = #tpu.pipeline_mode<synchronous>, transform_indices = @transform_4, window_bounds = array<i64: 1, 12>}, {transform_indices = @transform_5, window_bounds = array<i64: 32, 12>}]} {
    %c0 = arith.constant 0 : index
    %c0_0 = arith.constant 0 : index
    %0 = vector.load %arg1[%c0, %c0_0] : memref<32x16xf32, #tpu.memory_space<vmem>>, vector<32x16xf32>
    %1 = arith.truncf %0 : vector<32x16xf32> to vector<32x16xbf16>
    %c0_1 = arith.constant 0 : index
    %c0_2 = arith.constant 0 : index
    %2 = vector.load %arg2[%c0_1, %c0_2] : memref<16x32xbf16, #tpu.memory_space<vmem>>, vector<16x32xbf16>
    %cst = arith.constant dense<0.000000e+00> : vector<32x32xf32>
    %3 = tpu.matmul %1, %2, %cst {dimension_numbers = #tpu.dot_dimension_numbers<[1], [0], [0], [1], [0, 0, 1, 1], [], []>} : vector<32x16xbf16>, vector<16x32xbf16>, vector<32x32xf32> -> vector<32x32xf32>
    %c0_3 = arith.constant 0 : index
    %c0_4 = arith.constant 0 : index
    %4 = vector.load %arg3[%c0_3, %c0_4] : memref<1x32xf32, #tpu.memory_space<vmem>>, vector<1x32xf32>
    %5 = vector.broadcast %4 : vector<1x32xf32> to vector<32x32xf32>
    %6 = arith.addf %3, %5 : vector<32x32xf32>
    %7 = math.tanh %6 : vector<32x32xf32>
    %8 = arith.truncf %7 : vector<32x32xf32> to vector<32x32xbf16>
    %c0_5 = arith.constant 0 : index
    %c0_6 = arith.constant 0 : index
    %9 = vector.load %arg4[%c0_5, %c0_6] : memref<32x12xbf16, #tpu.memory_space<vmem>>, vector<32x12xbf16>
    %cst_7 = arith.constant dense<0.000000e+00> : vector<32x12xf32>
    %10 = tpu.matmul %8, %9, %cst_7 {dimension_numbers = #tpu.dot_dimension_numbers<[1], [0], [0], [1], [0, 0, 1, 1], [], []>} : vector<32x32xbf16>, vector<32x12xbf16>, vector<32x12xf32> -> vector<32x12xf32>
    %c0_8 = arith.constant 0 : index
    %c0_9 = arith.constant 0 : index
    %11 = vector.load %arg5[%c0_8, %c0_9] : memref<1x12xf32, #tpu.memory_space<vmem>>, vector<1x12xf32>
    %12 = vector.broadcast %11 : vector<1x12xf32> to vector<32x12xf32>
    %13 = arith.addf %10, %12 : vector<32x12xf32>
    %14 = vector.extract_strided_slice %13 {offsets = [0, 0], sizes = [32, 4], strides = [1, 1]} : vector<32x12xf32> to vector<32x4xf32>
    %cst_10 = arith.constant dense<0xFF800000> : vector<32xf32>
    %15 = vector.multi_reduction <maximumf>, %14, %cst_10 [1] : vector<32x4xf32> to vector<32xf32>
    %16 = vector.shape_cast %15 : vector<32xf32> to vector<32x1xf32>
    %17 = vector.broadcast %16 : vector<32x1xf32> to vector<32x4xf32>
    %18 = arith.subf %14, %17 : vector<32x4xf32>
    %19 = math.exp %18 : vector<32x4xf32>
    %cst_11 = arith.constant dense<0.000000e+00> : vector<32xf32>
    %20 = vector.multi_reduction <add>, %19, %cst_11 [1] : vector<32x4xf32> to vector<32xf32>
    %21 = vector.shape_cast %20 : vector<32xf32> to vector<32x1xf32>
    %22 = tpu.reciprocal %21 {approx = true} : vector<32x1xf32> -> vector<32x1xf32>
    %23 = vector.broadcast %22 : vector<32x1xf32> to vector<32x4xf32>
    %24 = arith.mulf %19, %23 : vector<32x4xf32>
    %25 = vector.extract_strided_slice %13 {offsets = [0, 4], sizes = [32, 4], strides = [1, 1]} : vector<32x12xf32> to vector<32x4xf32>
    %26 = math.exp %25 : vector<32x4xf32>
    %27 = vector.extract_strided_slice %13 {offsets = [0, 8], sizes = [32, 4], strides = [1, 1]} : vector<32x12xf32> to vector<32x4xf32>
    %28 = tpu.concatenate %24, %26, %27 in 1 : vector<32x4xf32>, vector<32x4xf32>, vector<32x4xf32> -> vector<32x12xf32>
    %c0_12 = arith.constant 0 : index
    %c0_13 = arith.constant 0 : index
    %29 = vector.load %arg6[%c0_12, %c0_13] : memref<32x12xf32, #tpu.memory_space<vmem>>, vector<32x12xf32>
    tpu.vector_store %arg6[%c0_12, %c0_13], %28 {strides = array<i32>} : memref<32x12xf32, #tpu.memory_space<vmem>>, vector<32x12xf32>,
    return
  }
  func.func @transform_0(%arg0: i32) -> (i32, i32) {
    %c0_i32 = arith.constant 0 : i32
    %c0_i32_0 = arith.constant 0 : i32
    return %arg0, %c0_i32 : i32, i32
  }
  func.func @transform_1(%arg0: i32) -> (i32, i32) {
    %c0_i32 = arith.constant 0 : i32
    %c0_i32_0 = arith.constant 0 : i32
    %c0_i32_1 = arith.constant 0 : i32
    return %c0_i32, %c0_i32_0 : i32, i32
  }
  func.func @transform_2(%arg0: i32) -> (i32, i32) {
    %c0_i32 = arith.constant 0 : i32
    %c0_i32_0 = arith.constant 0 : i32
    %c0_i32_1 = arith.constant 0 : i32
    return %c0_i32, %c0_i32_0 : i32, i32
  }
  func.func @transform_3(%arg0: i32) -> (i32, i32) {
    %c0_i32 = arith.constant 0 : i32
    %c0_i32_0 = arith.constant 0 : i32
    %c0_i32_1 = arith.constant 0 : i32
    return %c0_i32, %c0_i32_0 : i32, i32
  }
  func.func @transform_4(%arg0: i32) -> (i32, i32) {
    %c0_i32 = arith.constant 0 : i32
    %c0_i32_0 = arith.constant 0 : i32
    %c0_i32_1 = arith.constant 0 : i32
    return %c0_i32, %c0_i32_0 : i32, i32
  }
  func.func @transform_5(%arg0: i32) -> (i32, i32) {
    %c0_i32 = arith.constant 0 : i32
    %c0_i32_0 = arith.constant 0 : i32
    return %arg0, %c0_i32 : i32, i32
  }
}

</mosaic_0001>

<bundles_post_ra>
// kernel: tpu_custom_call.1
= control target key start
LH: loop header
LB: loop body
LE: loop exit
PB: predicated region body
PF: predicated region fallthrough
CT: control target
= control target key end

     0   :  { %s636_s18 = smov 0   ;;  %s719_s0 = inlined_call_operand.vmem [shape: f32[64,16], index: 0, kind: input, shape index: {}]   ;;  %s720_s1 = inlined_call_operand.vmem [shape: bf16[16,32], index: 1, kind: input, shape index: {}]   ;;  %s721_s2 = inlined_call_operand.vmem [shape: f32[1,32], index: 2, kind: input, shape index: {}]   ;;  %s722_s3 = inlined_call_operand.vmem [shape: bf16[32,12], index: 3, kind: input, shape index: {}]   ;;  %s723_s4 = inlined_call_operand.vmem [shape: f32[1,12], index: 4, kind: input, shape index: {}]   ;;  %s724_s5 = inlined_call_operand.vmem [shape: f32[64,12], index: 5, kind: output, shape index: {}]  }
   0x1 LB: > { %s514_s19 = sadd.s32 4294967295, %s604_s18   ;;  %p518_p0 = scmp.ge.s32.totalorder %s604_s18, 1  ;;  %s604_s18 = sphi %s636_s18, %s15_s18  }
   0x2   : > { %p188_p1 = scmp.lt.s32.totalorder %s604_s18, 3 }
   0x4   : > { %p189_p2 = pnand %p518_p0, %p188_p1 }
   0x5   : > { %v563_v0 = vld [vmem:[%s720_s1] sm:$0xff] (!%p189_p2)   ;;  %s519_s22 = sshll.u32 (!%p189_p2), %s514_s19, 2  ;;  %vm250_vm0 = vcmask (!%p189_p2), 130048   ;;  %v565_v8 = vld [vmem:[%s722_s3 + $0x8] sm:$0xff] (!%p189_p2)   ;;  %vm335_vm1 = vcmask (!%p189_p2), 261120   ;;  %vm391_vm2 = vcmask (!%p189_p2), 31744  }
   0x6   : > { %192 = sbr.rel (%p189_p2) target bundleno = 791 (0x317), region = 40  ;;  %p217_p3 = scmp.lt.s32.totalorder (!%p189_p2), %s519_s22, 7  ;;  %541 = vmatprep.subr.bf16.mxu0 (!%p189_p2), %v563_v0  ;;  %v564_v7 = vld [vmem:[%s722_s3] sm:$0xff] (!%p189_p2)   ;;  %vm448_vm3 = vcmask (!%p189_p2), 64512   ;;  %vm453_vm4 = vcmask (!%p189_p2), 97280  }
   0x7   : > { %542 = vmatpush3.bf16.msra.mxu0 (!%p189_p2), %v563_v0  ;;  %547 = vmatprep.subr.bf16.mxu1 (!%p189_p2), %v564_v7  ;;  %v523_v9 = vld [vmem:[%s721_s2] ss:$0 sm:$0xff] (!%p189_p2) }
   0x8   : > { %548 = vmatpush3.bf16.msra.mxu1 (!%p189_p2), %v564_v7  ;;  %v527_v24 = vld [vmem:[%s723_s4] ss:$0 sm:$0xff] (!%p189_p2) }
   0x9   : > { %549 = vmatprep.subr.bf16.mxu1 (!%p189_p2), %v565_v8 }
   0xc   : > { %550 = vmatpush3.bf16.msra.mxu1 (!%p189_p2), %v565_v8 }
   0xd   : > { %s726_s22 = smov (!%p217_p3, %s519_s22), 7 }
   0xe   : > { %s520_s23 = sshll.u32 %s726_s22, 3 }
   0xf   : > { %s220_s26 = scalar_lea.vmem %s719_s0, %s520_s23  ;;  %s226_s12 = scalar_lea.vmem %s724_s5, %s520_s23 }
  0x10   : > { %v229_v1 = vld [vmem:[%s220_s26] sm:$0xff]  ;;  %v230_v2 = vld [vmem:[%s220_s26 + $0x8] sm:$0xff]  ;;  %v231_v3 = vld [vmem:[%s220_s26 + $0x10] sm:$0xff] }
  0x11   : > { %v233_v4 = vpack.c.bf16 %v230_v2, %v229_v1  ;;  %v232_v5 = vld [vmem:[%s220_s26 + $0x18] sm:$0xff] }
  0x12   : > { %v234_v6 = vpack.c.bf16 %v232_v5, %v231_v3 }
  0x13   : > { %543 = vmatprep.mubr.msk.bf16.mxu0 %vm250_vm0, %v233_v4 }
  0x14   : > { %544 = vmatmul.mubr.msk.bf16.vlgmr.msra.gmra.mrb[0].mxu0 %vm250_vm0, %v234_v6 }
  0xe7   : > { %v545_v10 = vpop.f32.mrb[0].mxu0 }
  0xe8   : > { %v300_v11 = vadd.f32 %v545_v10, %v523_v9  ;;  %v291_v12 = vpop.f32.mrb[1].mxu0 }
  0xe9   : > { %v292_v13 = vadd.f32 %v523_v9, %v291_v12  ;;  %v546_v14 = vpop.f32.mrb[2].mxu0 }
  0xea   : > { %566 = vtanh.f32 %v300_v11  ;;  %v303_v15 = vadd.f32 %v546_v14, %v523_v9  ;;  %v294_v16 = vpop.f32.mrb[3].mxu0 }
  0xeb   : > { %568 = vtanh.f32 %v292_v13  ;;  %v295_v17 = vadd.f32 %v523_v9, %v294_v16 }
  0xec   : > { %570 = vtanh.f32 %v303_v15 }
  0xed   : > { %572 = vtanh.f32 %v295_v17 }
  0xf4   : > { %v567_v18 = vpop.eup %566 }
  0xf5   : > { %v569_v19 = vpop.eup %568 }
  0xf6   : > { %v571_v20 = vpop.eup %570 }
  0xf7   : > { %v573_v21 = vpop.eup %572  ;;  %v311_v22 = vpack.c.bf16 %v571_v20, %v567_v18 }
  0xf8   : > { %v310_v23 = vpack.c.bf16 %v573_v21, %v569_v19 }
  0xfa   : > { %551 = vmatprep.mubr.msk.bf16.mxu1 %vm335_vm1, %v310_v23 }
  0xfb   : > { %552 = vmatmul.mubr.msk.bf16.vlgmr.msra.gmra.mrb[0].mxu1 %vm335_vm1, %v311_v22 }
 0x1ce   : > { %v553_v25 = vpop.f32.mrb[0].mxu1 }
 0x1cf   : > { %v667_v26 = vadd.f32 %v553_v25, %v527_v24  ;;  %v376_v27 = vpop.f32.mrb[1].mxu1 }
 0x1d0   : > { %v669_v28 = vadd.f32 %v527_v24, %v376_v27  ;;  %v554_v29 = vpop.f32.mrb[2].mxu1 }
 0x1d1   : > { %v671_v30 = vadd.f32 %v554_v29, %v527_v24  ;;  %v379_v31 = vpop.f32.mrb[3].mxu1  ;;  %v398_v32 = vsel %vm391_vm2, %v667_v26, -inf  ;;  %v440_v60 = vmul.f32 1.442695, %v667_v26 }
 0x1d2   : > { %v675_v33 = vadd.f32 %v527_v24, %v379_v31  ;;  %399 = vmax.xlane.f32.xlu1 %v398_v32  ;;  %v392_v34 = vsel %vm391_vm2, %v669_v28, -inf  ;;  %v436_v57 = vmul.f32 1.442695, %v669_v28 }
 0x1d3   : > { %393 = vmax.xlane.f32.xlu0 %v392_v34  ;;  %v401_v35 = vsel %vm391_vm2, %v671_v30, -inf  ;;  %v442_v63 = vmul.f32 1.442695, %v671_v30 }
 0x1d4   : > { %v395_v36 = vsel %vm391_vm2, %v675_v33, -inf  ;;  %v438_v59 = vmul.f32 1.442695, %v675_v33 }
 0x1d6   : > { %402 = vmax.xlane.f32.xlu1 %v401_v35 }
 0x1d7   : > { %396 = vmax.xlane.f32.xlu0 %v395_v36 }
 0x25f   : > { %v400_v37 = vpop.xlane.xlu1 %399 }
 0x260   : > { %v406_v38 = vsub.f32 %v667_v26, %v400_v37  ;;  %v394_v39 = vpop.xlane.xlu0 %393 }
 0x261   : > { %v404_v40 = vsub.f32 %v669_v28, %v394_v39 }
 0x262   : > { %v412_v41 = vmul.f32 1.442695, %v406_v38 }
 0x263   : > { %v408_v42 = vmul.f32 1.442695, %v404_v40  ;;  %v403_v43 = vpop.xlane.xlu1 %402 }
 0x264   : > { %v407_v44 = vsub.f32 %v671_v30, %v403_v43  ;;  %v397_v45 = vpop.xlane.xlu0 %396 }
 0x265   : > { %574 = vpow2.f32 %v408_v42  ;;  %v405_v46 = vsub.f32 %v675_v33, %v397_v45 }
 0x266   : > { %576 = vpow2.f32 %v412_v41  ;;  %v414_v47 = vmul.f32 1.442695, %v407_v44 }
 0x267   : > { %v410_v48 = vmul.f32 1.442695, %v405_v46 }
 0x269   : > { %578 = vpow2.f32 %v410_v48 }
 0x26a   : > { %580 = vpow2.f32 %v414_v47 }
 0x26f   : > { %v575_v49 = vpop.eup %574 }
 0x270   : > { %v416_v50 = vsel %vm391_vm2, %v575_v49, 0.0  ;;  %v577_v51 = vpop.eup %576 }
 0x271   : > { %417 = vadd.xlane.f32.xlu0 %v416_v50  ;;  %v422_v53 = vsel %vm391_vm2, %v577_v51, 0.0 }
 0x273   : > { %v579_v52 = vpop.eup %578 }
 0x274   : > { %v419_v54 = vsel %vm391_vm2, %v579_v52, 0.0  ;;  %v581_v55 = vpop.eup %580 }
 0x275   : > { %423 = vadd.xlane.f32.xlu0 %v422_v53  ;;  %420 = vadd.xlane.f32.xlu1 %v419_v54  ;;  %v425_v56 = vsel %vm391_vm2, %v581_v55, 0.0 }
 0x279   : > { %426 = vadd.xlane.f32.xlu1 %v425_v56 }
 0x2fe   : > { %v418_v58 = vpop.xlane.xlu0 %417 }
 0x2ff   : > { %582 = vrcp.f32 %v418_v58 }
 0x300   : > { %584 = vpow2.f32 %v436_v57 }
 0x302   : > { %v421_v61 = vpop.xlane.xlu1 %420  ;;  %v424_v62 = vpop.xlane.xlu0 %423 }
 0x303   : > { %586 = vrcp.f32 %v421_v61 }
 0x304   : > { %588 = vrcp.f32 %v424_v62 }
 0x305   : > { %590 = vpow2.f32 %v438_v59 }
 0x306   : > { %592 = vpow2.f32 %v440_v60  ;;  %v427_v0 = vpop.xlane.xlu1 %426 }
 0x307   : > { %594 = vrcp.f32 %v427_v0 }
 0x308   : > { %596 = vpow2.f32 %v442_v63 }
 0x309   : > { %v583_v1 = vpop.eup %582 }
 0x30a   : > { %v432_v2 = vmul.f32 %v583_v1, %v575_v49  ;;  %v585_v3 = vpop.eup %584 }
 0x30c   : > { %v444_v4 = vsel %vm391_vm2, %v432_v2, %v585_v3 }
 0x30d   : > { %v587_v5 = vpop.eup %586  ;;  %v449_v6 = vsel %vm448_vm3, %v444_v4, %v669_v28 }
 0x30e   : > { %v589_v7 = vpop.eup %588  ;;  %454 = vst.msk [vmem:[%s226_s12] sm:$0xff] %vm453_vm4, %v449_v6  ;;  %v433_v8 = vmul.f32 %v587_v5, %v579_v52 }
 0x30f   : > { %v591_v9 = vpop.eup %590  ;;  %v434_v10 = vmul.f32 %v589_v7, %v577_v51 }
 0x310   : > { %v593_v11 = vpop.eup %592  ;;  %v445_v12 = vsel %vm391_vm2, %v433_v8, %v591_v9 }
 0x311   : > { %v595_v13 = vpop.eup %594  ;;  %v450_v14 = vsel %vm448_vm3, %v445_v12, %v675_v33  ;;  %v446_v15 = vsel %vm391_vm2, %v434_v10, %v593_v11 }
 0x312   : > { %455 = vst.msk [vmem:[%s226_s12 + $0x8] sm:$0xff] %vm453_vm4, %v450_v14  ;;  %v451_v16 = vsel %vm448_vm3, %v446_v15, %v667_v26  ;;  %v435_v17 = vmul.f32 %v595_v13, %v581_v55  ;;  %v597_v18 = vpop.eup %596 }
 0x313   : > { %456 = vst.msk [vmem:[%s226_s12 + $0x10] sm:$0xff] %vm453_vm4, %v451_v16 }
 0x314   : > { %v447_v19 = vsel %vm391_vm2, %v435_v17, %v597_v18 }
 0x315   : > { %v452_v20 = vsel %vm448_vm3, %v447_v19, %v671_v30 }
 0x316   : > { %457 = vst.msk [vmem:[%s226_s12 + $0x18] sm:$0xff] %vm453_vm4, %v452_v20 }
 0x317 PF: > { %s15_s18 = sadd.s32 1, %s604_s18  }
 0x318   : > { %p12_p4 = scmp.ge.s32.totalorder %s15_s18, 4  }
 0x31a   :  { %14 = sbr.rel (!%p12_p4) target bundleno = 1 (0x1), region = 70 }

</bundles_post_ra>
